<compile_context>
chip_gen: v5e
topology: v5e:2x2
jax: 0.10.0
libtpu: 0.0.40
codegen_flags: <defaults>
</compile_context>

<pallas_src>
import numpy as np
import jax
import jax.numpy as jnp
from jax.experimental import pallas as pl
from jax.experimental.pallas import tpu as pltpu

POOLING_SIZES = (1, 2, 3, 6)
BN_EPS = 1e-5
MXU_DTYPE = jnp.bfloat16           # MXU operand dtype (fp32 accumulation)
VMEM_LIMIT = 48 * 1024 * 1024      # above the scoped default, below v7x physical


# ----------------------------------------------------------------------------
# Trace-time constant matrices (glue, numpy).
# ----------------------------------------------------------------------------
def _adaptive_avg_pool_matrix(out_size, in_size):
    """nn.AdaptiveAvgPool2d bin semantics along one axis, as a linear map."""
    P = np.zeros((out_size, in_size), np.float32)
    for i in range(out_size):
        start = (i * in_size) // out_size
        end = -((-(i + 1) * in_size) // out_size)  # ceil((i+1)*in/out)
        P[i, start:end] = 1.0 / (end - start)
    return P


def _bilinear_matrix(out_size, in_size):
    """F.interpolate(mode='bilinear', align_corners=False) along one axis."""
    U = np.zeros((out_size, in_size), np.float32)
    scale = in_size / out_size
    for i in range(out_size):
        src = (i + 0.5) * scale - 0.5
        src = max(src, 0.0)
        i0 = min(int(np.floor(src)), in_size - 1)
        i1 = min(i0 + 1, in_size - 1)
        lam = src - i0
        U[i, i0] += 1.0 - lam
        U[i, i1] += lam
    return U


def _round_up(v, m):
    return ((v + m - 1) // m) * m


def _largest_divisor_tile(total, cap, quantum):
    """Largest multiple of `quantum` that divides `total` and is <= cap."""
    best = None
    d = quantum
    cap = min(cap, total)
    while d <= cap:
        if total % d == 0:
            best = d
        d += quantum
    return best if best is not None else total


def _stacked_branch_constants(H, W, sizes, cq):
    """Stack the per-branch pooling / upsample maps and the block-diag mask."""
    s2 = [s * s for s in sizes]
    S2 = sum(s2)                      # 1 + 4 + 9 + 36 = 50 bins total
    S2P = _round_up(S2, 8)            # sublane-friendly
    HW = H * W
    CB = cq * len(sizes)
    P_all = np.zeros((S2P, HW), np.float32)   # stacked adaptive-avg-pool rows
    M_all = np.zeros((HW, S2P), np.float32)   # stacked bilinear upsample cols
    mask = np.zeros((S2P, CB), np.float32)    # keep only (branch b rows, branch b cols)
    off = 0
    for b, s in enumerate(sizes):
        Ph = _adaptive_avg_pool_matrix(s, H)
        Pw = _adaptive_avg_pool_matrix(s, W)
        Uh = _bilinear_matrix(H, s)
        Uw = _bilinear_matrix(W, s)
        P_all[off:off + s * s, :] = np.kron(Ph, Pw)   # flat spatial = h*W + w
        M_all[:, off:off + s * s] = np.kron(Uh, Uw)
        mask[off:off + s * s, b * cq:(b + 1) * cq] = 1.0
        off += s * s
    return P_all, M_all, mask


# ----------------------------------------------------------------------------
# Parameters (deterministic synthetic init).
# ----------------------------------------------------------------------------
def init_params(key, in_channels, out_channels, sizes=POOLING_SIZES):
    nb = len(sizes)
    cq = in_channels // nb
    ct = in_channels + cq * nb
    cmid = ct // 4
    ks = jax.random.split(key, 12)
    f32 = jnp.float32
    p = {
        "w1": jax.random.normal(ks[0], (nb, in_channels, cq), f32) / np.sqrt(in_channels),
        "bn1_gamma": 1.0 + 0.1 * jax.random.normal(ks[1], (nb, 1, cq), f32),
        "bn1_beta": 0.1 * jax.random.normal(ks[2], (nb, 1, cq), f32),
        "bn1_mean": 0.1 * jax.random.normal(ks[3], (nb, 1, cq), f32),
        "bn1_var": 1.0 + 0.1 * jnp.abs(jax.random.normal(ks[4], (nb, 1, cq), f32)),
        "w3": jax.random.normal(ks[5], (3, 3, ct, cmid), f32) / np.sqrt(9 * ct),
        "bn2_gamma": 1.0 + 0.1 * jax.random.normal(ks[6], (1, cmid), f32),
        "bn2_beta": 0.1 * jax.random.normal(ks[7], (1, cmid), f32),
        "bn2_mean": 0.1 * jax.random.normal(ks[8], (1, cmid), f32),
        "bn2_var": 1.0 + 0.1 * jnp.abs(jax.random.normal(ks[9], (1, cmid), f32)),
        "wf": jax.random.normal(ks[10], (cmid, out_channels), f32) / np.sqrt(cmid),
        "bias_f": 0.1 * jax.random.normal(ks[11], (1, out_channels), f32),
    }
    return p


# ----------------------------------------------------------------------------
# Forward wrapper (layout glue + two Pallas kernels).
# ----------------------------------------------------------------------------
def psp_head_forward(x_nchw, params, sizes=POOLING_SIZES):
    N, C, H, W = x_nchw.shape
    nb = len(sizes)
    assert C % nb == 0, "in_channels must be divisible by number of pooling sizes"
    cq = C // nb
    CB = cq * nb
    Ct = C + CB
    assert Ct % 4 == 0
    HW = H * W

    # ------------------- layout & trace-time constants ---------------------
    xr16 = jnp.transpose(x_nchw, (0, 2, 3, 1)).reshape(N, HW, C).astype(MXU_DTYPE)

    P_np, M_np, mask_np = _stacked_branch_constants(H, W, sizes, cq)
    S2P = P_np.shape[0]
    P16 = jnp.asarray(P_np, MXU_DTYPE)
    M16 = jnp.asarray(M_np, MXU_DTYPE)
    mask = jnp.asarray(mask_np, jnp.float32)

    # concatenated 1x1 conv weights + folded eval-mode BN (per-branch blocks)
    w1cat = jnp.transpose(params["w1"], (1, 0, 2)).reshape(C, CB).astype(MXU_DTYPE)
    sc1 = params["bn1_gamma"] / jnp.sqrt(params["bn1_var"] + BN_EPS)     # (nb,1,cq)
    sh1 = params["bn1_beta"] - params["bn1_mean"] * sc1
    sc1cat = jnp.transpose(sc1, (1, 0, 2)).reshape(1, CB).astype(jnp.float32)
    sh1cat = jnp.transpose(sh1, (1, 0, 2)).reshape(1, CB).astype(jnp.float32)

    # spatial tile for the pyramid / fused-concat output
    thw = _largest_divisor_tile(HW, max(HW // 2, 8), 8)
    n_hw = HW // thw

    # ------------- kernel 1: pyramid pooling + fused channel concat --------
    def pyramid_kernel(xf_ref, xt_ref, p_ref, w_ref, sc_ref, sh_ref, msk_ref,
                       m_ref, o_ref, act_ref):
        t = pl.program_id(1)

        @pl.when(t == 0)
        def _():
            # stacked adaptive avg-pool -> 1x1 conv -> BN(eval) -> ReLU -> mask
            pooled = jnp.dot(p_ref[...], xf_ref[0],
                             preferred_element_type=jnp.float32)            # (S2P, C)
            act = jnp.dot(pooled.astype(MXU_DTYPE), w_ref[...],
                          preferred_element_type=jnp.float32)               # (S2P, CB)
            act = jnp.maximum(act * sc_ref[...] + sh_ref[...], 0.0)
            act_ref[...] = (act * msk_ref[...]).astype(act_ref.dtype)

        # stacked bilinear upsample for this spatial tile (single MXU matmul)
        up = jnp.dot(m_ref[...], act_ref[...],
                     preferred_element_type=jnp.float32)                    # (thw, CB)
        # fused channel concat [x | branches]: one lane-dense store per tile
        o_ref[0] = jnp.concatenate([xt_ref[0], up.astype(o_ref.dtype)], axis=-1)

    pyr_flops = N * (2 * S2P * HW * C + 2 * S2P * C * CB + 2 * HW * S2P * CB)
    pyr_bytes = 2 * (2 * N * HW * C + N * HW * Ct + S2P * HW + HW * S2P + C * CB)

    feat = pl.pallas_call(
        pyramid_kernel,
        out_shape=jax.ShapeDtypeStruct((N, HW, Ct), MXU_DTYPE),
        grid=(N, n_hw),
        in_specs=[
            pl.BlockSpec((1, HW, C), lambda n, t: (n, 0, 0)),    # x (full, resident per n)
            pl.BlockSpec((1, thw, C), lambda n, t: (n, t, 0)),   # x spatial tile (concat copy)
            pl.BlockSpec((S2P, HW), lambda n, t: (0, 0)),        # stacked pooling matrix
            pl.BlockSpec((C, CB), lambda n, t: (0, 0)),          # concat'd 1x1 conv weights
            pl.BlockSpec((1, CB), lambda n, t: (0, 0)),          # folded BN scale
            pl.BlockSpec((1, CB), lambda n, t: (0, 0)),          # folded BN shift
            pl.BlockSpec((S2P, CB), lambda n, t: (0, 0)),        # block-diagonal branch mask
            pl.BlockSpec((thw, S2P), lambda n, t: (t, 0)),       # upsample matrix tile
        ],
        out_specs=pl.BlockSpec((1, thw, Ct), lambda n, t: (n, t, 0)),
        scratch_shapes=[pltpu.VMEM((S2P, CB), MXU_DTYPE)],       # per-batch branch activations
        compiler_params=pltpu.CompilerParams(
            dimension_semantics=("parallel", "arbitrary"),
            vmem_limit_bytes=VMEM_LIMIT),
        cost_estimate=pl.CostEstimate(flops=int(pyr_flops), transcendentals=0,
                                      bytes_accessed=int(pyr_bytes)),
    )(xr16, xr16, P16, w1cat, sc1cat, sh1cat, mask, M16)

    # ------ kernel 2: FCNHead — 3x3 conv (halo'd taps) -> BN -> ReLU -> 1x1 -
    cmid = Ct // 4
    cout = params["wf"].shape[1]
    cmid_p = _round_up(cmid, 128)     # lane-dense accumulator / MXU N-dim
    cout_p = _round_up(cout, 128)     # lane-dense final store
    Hp, Wp = H + 2, W + 2

    th = _largest_divisor_tile(H, max(1, min(H // 2, max(1, 512 // W))), 1)
    n_h = H // th
    rows = th * W                     # output rows per grid step

    # spatial zero-pad once (this is the only extra copy of the feature map)
    feat_pad = jnp.pad(feat.reshape(N, H, W, Ct), ((0, 0), (1, 1), (1, 1), (0, 0)))
    feat_hbm = feat_pad.reshape(N * Hp, Wp, Ct)      # bf16, stays in HBM (pl.ANY)

    w3p = jnp.pad(params["w3"].reshape(9, Ct, cmid),
                  ((0, 0), (0, 0), (0, cmid_p - cmid))).astype(MXU_DTYPE)
    sc2 = params["bn2_gamma"] / jnp.sqrt(params["bn2_var"] + BN_EPS)
    sh2 = params["bn2_beta"] - params["bn2_mean"] * sc2
    sc2p = jnp.pad(sc2, ((0, 0), (0, cmid_p - cmid)), constant_values=1.0)
    sh2p = jnp.pad(sh2, ((0, 0), (0, cmid_p - cmid)))
    wfp = jnp.pad(params["wf"], ((0, cmid_p - cmid), (0, cout_p - cout))).astype(MXU_DTYPE)
    biasp = jnp.pad(params["bias_f"], ((0, 0), (0, cout_p - cout)))

    def head_kernel(feat_ref, w3_ref, sc_ref, sh_ref, wf_ref, b_ref, o_ref,
                    fbuf, sem, acc_ref):
        n = pl.program_id(0)
        ih = pl.program_id(1)
        n_tiles = pl.num_programs(1)
        slot = ih % 2

        def issue(row_tile, sl):
            # DMA a (th+2)-row halo slab of batch element `n` into VMEM slot `sl`.
            row0 = n * Hp + row_tile * th
            pltpu.make_async_copy(feat_ref.at[pl.ds(row0, th + 2)],
                                  fbuf.at[sl], sem.at[sl]).start()

        @pl.when(ih == 0)                 # prime this batch element's pipeline
        def _():
            issue(0, 0)

        @pl.when(ih + 1 < n_tiles)        # prefetch the next slab while computing
        def _():
            issue(ih + 1, 1 - slot)

        pltpu.make_async_copy(feat_ref.at[pl.ds(0, th + 2)],
                              fbuf.at[slot], sem.at[slot]).wait()

        # 3x3 conv as nine shifted GEMMs accumulated in fp32 (no im2col in HBM)
        slab = fbuf[slot]                 # (th+2, Wp, Ct)
        for k in range(9):
            dh, dw = k // 3, k % 3
            tap = slab[dh:dh + th, dw:dw + W, :].reshape(rows, Ct)
            contrib = jnp.dot(tap, w3_ref[k], preferred_element_type=jnp.float32)
            if k == 0:
                acc_ref[...] = contrib
            else:
                acc_ref[...] += contrib

        # fused epilogue: BN(eval) -> ReLU -> 1x1 conv (+bias)
        h = jnp.maximum(acc_ref[...] * sc_ref[...] + sh_ref[...], 0.0)
        # TODO(synk): nn.Dropout(0.1) is identity at inference; training-mode
        # dropout is not implemented.
        o_ref[0] = jnp.dot(h.astype(MXU_DTYPE), wf_ref[...],
                           preferred_element_type=jnp.float32) + b_ref[...]

    head_flops = N * HW * (2 * 9 * Ct * cmid_p + 2 * cmid_p * cout_p)
    head_bytes = 2 * (N * Hp * Wp * Ct + 9 * Ct * cmid_p + cmid_p * cout_p) \
        + 4 * N * HW * cout_p

    out_flat = pl.pallas_call(
        head_kernel,
        out_shape=jax.ShapeDtypeStruct((N, HW, cout_p), jnp.float32),
        grid=(N, n_h),
        in_specs=[
            pl.BlockSpec(memory_space=pl.ANY),                        # feature map in HBM
            pl.BlockSpec((9, Ct, cmid_p), lambda n, i: (0, 0, 0)),    # 3x3 weights (resident)
            pl.BlockSpec((1, cmid_p), lambda n, i: (0, 0)),           # folded BN scale
            pl.BlockSpec((1, cmid_p), lambda n, i: (0, 0)),           # folded BN shift
            pl.BlockSpec((cmid_p, cout_p), lambda n, i: (0, 0)),      # final 1x1 weights
            pl.BlockSpec((1, cout_p), lambda n, i: (0, 0)),           # final bias
        ],
        out_specs=pl.BlockSpec((1, rows, cout_p), lambda n, i: (n, i, 0)),
        scratch_shapes=[
            pltpu.VMEM((2, th + 2, Wp, Ct), MXU_DTYPE),   # double-buffered halo slabs
            pltpu.SemaphoreType.DMA((2,)),
            pltpu.VMEM((rows, cmid_p), jnp.float32),      # fp32 conv accumulator
        ],
        compiler_params=pltpu.CompilerParams(
            dimension_semantics=("parallel", "arbitrary"),
            vmem_limit_bytes=VMEM_LIMIT),
        cost_estimate=pl.CostEstimate(flops=int(head_flops), transcendentals=0,
                                      bytes_accessed=int(head_bytes)),
    )(feat_hbm, w3p, sc2p, sh2p, wfp, biasp)

    out = out_flat[:, :, :cout].reshape(N, H, W, cout)
    return jnp.transpose(out, (0, 3, 1, 2))  # back to NCHW, matching PyTorch


# ----------------------------------------------------------------------------
# Pure numpy (float64) reference for a sanity check.
# ----------------------------------------------------------------------------
def _reference(x_nchw, params, sizes=POOLING_SIZES):
    x = np.asarray(x_nchw, np.float64)
    N, C, H, W = x.shape
    HW = H * W
    xr = np.transpose(x, (0, 2, 3, 1)).reshape(N, HW, C)
    g = {k: np.asarray(v, np.float64) for k, v in params.items()}
    sc1 = g["bn1_gamma"] / np.sqrt(g["bn1_var"] + BN_EPS)
    sh1 = g["bn1_beta"] - g["bn1_mean"] * sc1
    branch_outs = []
    for b, s in enumerate(sizes):
        P = np.kron(_adaptive_avg_pool_matrix(s, H),
                    _adaptive_avg_pool_matrix(s, W)).astype(np.float64)
        M = np.kron(_bilinear_matrix(H, s), _bilinear_matrix(W, s)).astype(np.float64)
        pooled = np.einsum("px,nxc->npc", P, xr)
        act = np.maximum(np.einsum("npc,cd->npd", pooled, g["w1"][b]) * sc1[b] + sh1[b], 0.0)
        branch_outs.append(np.einsum("xp,npd->nxd", M, act))
    feat = np.concatenate([xr] + branch_outs, axis=-1)
    Ct = feat.shape[-1]
    featw = feat.reshape(N, H, W, Ct)
    pad = np.pad(featw, ((0, 0), (1, 1), (1, 1), (0, 0)))
    cols = [pad[:, dh:dh + H, dw:dw + W, :] for dh in range(3) for dw in range(3)]
    patches = np.stack(cols, axis=3).reshape(N * HW, 9 * Ct)
    cmid = Ct // 4
    sc2 = g["bn2_gamma"] / np.sqrt(g["bn2_var"] + BN_EPS)
    sh2 = g["bn2_beta"] - g["bn2_mean"] * sc2
    h = np.maximum(patches @ g["w3"].reshape(9 * Ct, cmid) * sc2 + sh2, 0.0)
    out = h @ g["wf"] + g["bias_f"]
    return np.transpose(out.reshape(N, H, W, -1), (0, 3, 1, 2))


if __name__ == "__main__":
    key = jax.random.PRNGKey(0)
    k_x, k_p = jax.random.split(key)
    in_channels, out_channels = 8, 4
    N, H, W = 2, 16, 16

    x = jax.random.normal(k_x, (N, in_channels, H, W), jnp.float32)  # NCHW (PyTorch)
    params = init_params(k_p, in_channels, out_channels)

    out = jax.block_until_ready(psp_head_forward(x, params))

    assert out.shape == (N, out_channels, H, W), out.shape
    assert bool(jnp.all(jnp.isfinite(out)))

    ref = _reference(np.asarray(x), {k: np.asarray(v) for k, v in params.items()})
    np.testing.assert_allclose(np.asarray(out), ref, rtol=5e-2, atol=5e-2)

    print("KERNEL_OK")
</pallas_src>

<mosaic_0001>
module attributes {stable_mosaic.version = 11 : i64} {
  func.func @pyramid_kernel(%arg0: i32, %arg1: i32, %arg2: memref<1x256x8xbf16, #tpu.memory_space<vmem>>, %arg3: memref<1x128x8xbf16, #tpu.memory_space<vmem>>, %arg4: memref<56x256xbf16, #tpu.memory_space<vmem>>, %arg5: memref<8x8xbf16, #tpu.memory_space<vmem>>, %arg6: memref<1x8xf32, #tpu.memory_space<vmem>>, %arg7: memref<1x8xf32, #tpu.memory_space<vmem>>, %arg8: memref<56x8xf32, #tpu.memory_space<vmem>>, %arg9: memref<128x56xbf16, #tpu.memory_space<vmem>>, %arg10: memref<1x128x16xbf16, #tpu.memory_space<vmem>>, %arg11: memref<56x8xbf16, #tpu.memory_space<vmem>>) attributes {dimension_semantics = [#tpu.dimension_semantics<parallel>, #tpu.dimension_semantics<arbitrary>], iteration_bounds = array<i64: 2, 2>, scalar_prefetch = 0 : i64, scratch_operands = 1 : i64, tpu.core_type = #tpu.core_type<tc>, window_params = [{transform_indices = @transform_0, window_bounds = array<i64: 1, 256, 8>}, {transform_indices = @transform_1, window_bounds = array<i64: 1, 128, 8>}, {pipeline_mode = #tpu.pipeline_mode<synchronous>, transform_indices = @transform_2, window_bounds = array<i64: 56, 256>}, {pipeline_mode = #tpu.pipeline_mode<synchronous>, transform_indices = @transform_3, window_bounds = array<i64: 8, 8>}, {pipeline_mode = #tpu.pipeline_mode<synchronous>, transform_indices = @transform_4, window_bounds = array<i64: 1, 8>}, {pipeline_mode = #tpu.pipeline_mode<synchronous>, transform_indices = @transform_5, window_bounds = array<i64: 1, 8>}, {pipeline_mode = #tpu.pipeline_mode<synchronous>, transform_indices = @transform_6, window_bounds = array<i64: 56, 8>}, {transform_indices = @transform_7, window_bounds = array<i64: 128, 56>}, {transform_indices = @transform_8, window_bounds = array<i64: 1, 128, 16>}]} {
    %c0_i32 = arith.constant 0 : i32
    %0 = arith.cmpi eq, %arg1, %c0_i32 : i32
    %1 = arith.extui %0 : i1 to i32
    %c0_i32_0 = arith.constant 0 : i32
    %2 = arith.cmpi ne, %1, %c0_i32_0 : i32
    scf.if %2 {
      %c0_10 = arith.constant 0 : index
      %c0_11 = arith.constant 0 : index
      %13 = vector.load %arg4[%c0_10, %c0_11] : memref<56x256xbf16, #tpu.memory_space<vmem>>, vector<56x256xbf16>
      %c0_12 = arith.constant 0 : index
      %c0_13 = arith.constant 0 : index
      %c0_14 = arith.constant 0 : index
      %14 = vector.load %arg2[%c0_12, %c0_13, %c0_14] : memref<1x256x8xbf16, #tpu.memory_space<vmem>>, vector<1x256x8xbf16>
      %15 = vector.shape_cast %14 : vector<1x256x8xbf16> to vector<256x8xbf16>
      %cst_15 = arith.constant dense<0.000000e+00> : vector<56x8xf32>
      %16 = tpu.matmul %13, %15, %cst_15 {dimension_numbers = #tpu.dot_dimension_numbers<[1], [0], [0], [1], [0, 0, 1, 1], [], []>} : vector<56x256xbf16>, vector<256x8xbf16>, vector<56x8xf32> -> vector<56x8xf32>
      %17 = arith.truncf %16 : vector<56x8xf32> to vector<56x8xbf16>
      %c0_16 = arith.constant 0 : index
      %c0_17 = arith.constant 0 : index
      %18 = vector.load %arg5[%c0_16, %c0_17] : memref<8x8xbf16, #tpu.memory_space<vmem>>, vector<8x8xbf16>
      %cst_18 = arith.constant dense<0.000000e+00> : vector<56x8xf32>
      %19 = tpu.matmul %17, %18, %cst_18 {dimension_numbers = #tpu.dot_dimension_numbers<[1], [0], [0], [1], [0, 0, 1, 1], [], []>} : vector<56x8xbf16>, vector<8x8xbf16>, vector<56x8xf32> -> vector<56x8xf32>
      %c0_19 = arith.constant 0 : index
      %c0_20 = arith.constant 0 : index
      %20 = vector.load %arg6[%c0_19, %c0_20] : memref<1x8xf32, #tpu.memory_space<vmem>>, vector<1x8xf32>
      %21 = vector.broadcast %20 : vector<1x8xf32> to vector<56x8xf32>
      %22 = arith.mulf %19, %21 : vector<56x8xf32>
      %c0_21 = arith.constant 0 : index
      %c0_22 = arith.constant 0 : index
      %23 = vector.load %arg7[%c0_21, %c0_22] : memref<1x8xf32, #tpu.memory_space<vmem>>, vector<1x8xf32>
      %24 = vector.broadcast %23 : vector<1x8xf32> to vector<56x8xf32>
      %25 = arith.addf %22, %24 : vector<56x8xf32>
      %cst_23 = arith.constant 0.000000e+00 : f32
      %26 = vector.broadcast %cst_23 : f32 to vector<56x8xf32>
      %27 = arith.maximumf %25, %26 : vector<56x8xf32>
      %c0_24 = arith.constant 0 : index
      %c0_25 = arith.constant 0 : index
      %28 = vector.load %arg8[%c0_24, %c0_25] : memref<56x8xf32, #tpu.memory_space<vmem>>, vector<56x8xf32>
      %29 = arith.mulf %27, %28 : vector<56x8xf32>
      %30 = arith.truncf %29 : vector<56x8xf32> to vector<56x8xbf16>
      %c0_26 = arith.constant 0 : index
      %c0_27 = arith.constant 0 : index
      %31 = vector.load %arg11[%c0_26, %c0_27] : memref<56x8xbf16, #tpu.memory_space<vmem>>, vector<56x8xbf16>
      tpu.vector_store %arg11[%c0_26, %c0_27], %30 {strides = array<i32>} : memref<56x8xbf16, #tpu.memory_space<vmem>>, vector<56x8xbf16>,
    } else {
    }
    %c0 = arith.constant 0 : index
    %c0_1 = arith.constant 0 : index
    %3 = vector.load %arg9[%c0, %c0_1] : memref<128x56xbf16, #tpu.memory_space<vmem>>, vector<128x56xbf16>
    %c0_2 = arith.constant 0 : index
    %c0_3 = arith.constant 0 : index
    %4 = vector.load %arg11[%c0_2, %c0_3] : memref<56x8xbf16, #tpu.memory_space<vmem>>, vector<56x8xbf16>
    %cst = arith.constant dense<0.000000e+00> : vector<128x8xf32>
    %5 = tpu.matmul %3, %4, %cst {dimension_numbers = #tpu.dot_dimension_numbers<[1], [0], [0], [1], [0, 0, 1, 1], [], []>} : vector<128x56xbf16>, vector<56x8xbf16>, vector<128x8xf32> -> vector<128x8xf32>
    %c0_4 = arith.constant 0 : index
    %c0_5 = arith.constant 0 : index
    %c0_6 = arith.constant 0 : index
    %6 = vector.load %arg3[%c0_4, %c0_5, %c0_6] : memref<1x128x8xbf16, #tpu.memory_space<vmem>>, vector<1x128x8xbf16>
    %7 = vector.shape_cast %6 : vector<1x128x8xbf16> to vector<128x8xbf16>
    %8 = arith.truncf %5 : vector<128x8xf32> to vector<128x8xbf16>
    %9 = tpu.concatenate %7, %8 in 1 : vector<128x8xbf16>, vector<128x8xbf16> -> vector<128x16xbf16>
    %c0_7 = arith.constant 0 : index
    %c0_8 = arith.constant 0 : index
    %c0_9 = arith.constant 0 : index
    %10 = vector.load %arg10[%c0_7, %c0_8, %c0_9] : memref<1x128x16xbf16, #tpu.memory_space<vmem>>, vector<1x128x16xbf16>
    %11 = vector.shape_cast %10 : vector<1x128x16xbf16> to vector<128x16xbf16>
    %12 = vector.shape_cast %9 : vector<128x16xbf16> to vector<1x128x16xbf16>
    tpu.vector_store %arg10[%c0_7, %c0_8, %c0_9], %12 {strides = array<i32>} : memref<1x128x16xbf16, #tpu.memory_space<vmem>>, vector<1x128x16xbf16>,
    return
  }
  func.func @transform_0(%arg0: i32, %arg1: i32) -> (i32, i32, i32) {
    %c0_i32 = arith.constant 0 : i32
    %c0_i32_0 = arith.constant 0 : i32
    %c0_i32_1 = arith.constant 0 : i32
    return %arg0, %c0_i32, %c0_i32_0 : i32, i32, i32
  }
  func.func @transform_1(%arg0: i32, %arg1: i32) -> (i32, i32, i32) {
    %c0_i32 = arith.constant 0 : i32
    %c0_i32_0 = arith.constant 0 : i32
    return %arg0, %arg1, %c0_i32 : i32, i32, i32
  }
  func.func @transform_2(%arg0: i32, %arg1: i32) -> (i32, i32) {
    %c0_i32 = arith.constant 0 : i32
    %c0_i32_0 = arith.constant 0 : i32
    %c0_i32_1 = arith.constant 0 : i32
    return %c0_i32, %c0_i32_0 : i32, i32
  }
  func.func @transform_3(%arg0: i32, %arg1: i32) -> (i32, i32) {
    %c0_i32 = arith.constant 0 : i32
    %c0_i32_0 = arith.constant 0 : i32
    %c0_i32_1 = arith.constant 0 : i32
    return %c0_i32, %c0_i32_0 : i32, i32
  }
  func.func @transform_4(%arg0: i32, %arg1: i32) -> (i32, i32) {
    %c0_i32 = arith.constant 0 : i32
    %c0_i32_0 = arith.constant 0 : i32
    %c0_i32_1 = arith.constant 0 : i32
    return %c0_i32, %c0_i32_0 : i32, i32
  }
  func.func @transform_5(%arg0: i32, %arg1: i32) -> (i32, i32) {
    %c0_i32 = arith.constant 0 : i32
    %c0_i32_0 = arith.constant 0 : i32
    %c0_i32_1 = arith.constant 0 : i32
    return %c0_i32, %c0_i32_0 : i32, i32
  }
  func.func @transform_6(%arg0: i32, %arg1: i32) -> (i32, i32) {
    %c0_i32 = arith.constant 0 : i32
    %c0_i32_0 = arith.constant 0 : i32
    %c0_i32_1 = arith.constant 0 : i32
    return %c0_i32, %c0_i32_0 : i32, i32
  }
  func.func @transform_7(%arg0: i32, %arg1: i32) -> (i32, i32) {
    %c0_i32 = arith.constant 0 : i32
    %c0_i32_0 = arith.constant 0 : i32
    return %arg1, %c0_i32 : i32, i32
  }
  func.func @transform_8(%arg0: i32, %arg1: i32) -> (i32, i32, i32) {
    %c0_i32 = arith.constant 0 : i32
    %c0_i32_0 = arith.constant 0 : i32
    return %arg0, %arg1, %c0_i32 : i32, i32, i32
  }
}

</mosaic_0001>

<bundles_post_ra>
// kernel: tpu_custom_call.1
= control target key start
LH: loop header
LB: loop body
LE: loop exit
PB: predicated region body
PF: predicated region fallthrough
CT: control target
= control target key end

     0   :  { %s1623_s27 = smov 0   ;;  %s1625_s28 = smov 0   ;;  %s1860_s0 = inlined_call_operand.vmem [shape: bf16[2,256,8], index: 0, kind: input, shape index: {}]   ;;  %s1861_s1 = inlined_call_operand.vmem [shape: bf16[2,256,8], index: 1, kind: input, shape index: {}]   ;;  %s1862_s2 = inlined_call_operand.vmem [shape: bf16[56,256], index: 2, kind: input, shape index: {}]   ;;  %s1863_s3 = inlined_call_operand.vmem [shape: bf16[8,8], index: 3, kind: input, shape index: {}]   ;;  %s1864_s4 = inlined_call_operand.vmem [shape: f32[1,8], index: 4, kind: input, shape index: {}]   ;;  %s1865_s5 = inlined_call_operand.vmem [shape: f32[1,8], index: 5, kind: input, shape index: {}]   ;;  %s1866_s6 = inlined_call_operand.vmem [shape: f32[56,8], index: 6, kind: input, shape index: {}]   ;;  %s1867_s7 = inlined_call_operand.vmem [shape: bf16[256,56], index: 7, kind: input, shape index: {}]   ;;  %s1868_s8 = inlined_call_operand.vmem [shape: bf16[2,256,16], index: 8, kind: output, shape index: {}]  }
   0x1   :  { %s1627_s29 = smov 0   ;;  %s1629_s30 = smov 0  }
   0x2   :  { %s1631_s9 = smov 0  }
   0x3 LB: > { %s27_s10 = sadd.s32 1, %s1567_s29  ;;  %s30_s11 = sadd.s32 1, %s1571_s30  ;;  %s1575_s9 = sphi %s1631_s9, %s18_s9   ;;  %s1571_s30 = sphi %s1629_s30, %s1876_s30   ;;  %s1567_s29 = sphi %s1627_s29, %s1875_s29   ;;  %s1563_s28 = sphi %s1625_s28, %s1874_s28   ;;  %s1559_s27 = sphi %s1623_s27, %s1873_s27  }
   0x4   : > { %p28_p0 = scmp.ge.s32.totalorder %s27_s10, 2  ;;  %p1234_p1 = scmp.ge.s32.totalorder %s1575_s9, 1 }
   0x5   : > { %p304_p2 = scmp.lt.s32.totalorder %s1575_s9, 5 }
   0x6   : > { %s1878_s10 = smov (%p28_p0, %s27_s10), 0  ;;  %s1880_s11 = smov (!%p28_p0, %s30_s11), %s1571_s30 }
   0x7   : > { %1869 = sst [smem:[#allocation3_spill]] %s1878_s10  ;;  %p305_p3 = pnand %p1234_p1, %p304_p2 }
   0x8   : > { %p32_p4 = scmp.ge.s32.totalorder %s1880_s11, 2  ;;  %p356_p5 = scmp.lt.s32.totalorder (!%p305_p3), %s1563_s28, 1 }
   0x9   : > { %308 = sbr.rel (%p305_p3) target bundleno = 732 (0x2dc), region = 52  ;;  %s1237_s12 = sshll.u32 (!%p305_p3), %s1559_s27, 4 }
   0xa   : > { %s1882_s11 = smov (%p32_p4, %s1880_s11), 0  ;;  %p364_p6 = scmp.lt.s32.totalorder (!%p305_p3), %s1237_s12, 31 }
   0xb   : > { %1870 = sst [smem:[#allocation4_spill]] %s1882_s11  ;;  %p1245_p7 = scmp.ne.s32.totalorder (!%p305_p3), %s1559_s27, 0 }
   0xe   : > { %s1884_s28 = smov (!%p356_p5, %s1563_s28), 1  ;;  %s1886_s12 = smov (!%p364_p6, %s1237_s12), 31 }
   0xf   : > { %s1424_s13 = sshll.u32 %s1884_s28, 7  ;;  %s1238_s14 = sshll.u32 %s1884_s28, 5 }
  0x10   : > { %s1659_s17 = scalar_lea.vmem %s1860_s0, %s1424_s13  ;;  %s367_s18 = sadd.s32 %s1238_s14, %s1886_s12 }
  0x11   : > { %s1239_s19 = sshll.u32 %s367_s18, 2  ;;  %s1241_s20 = sshll.u32 %s1886_s12, 2 }
  0x12   : > { %s1664_s23 = scalar_lea.vmem %s1861_s1, %s1239_s19  ;;  %s1669_s26 = scalar_lea.vmem %s1867_s7, %s1241_s20 }
  0x13   : > { %s1674_s10 = scalar_lea.vmem %s1868_s8, %s1239_s19  ;;  %391 = sbr.rel (%p1245_p7) target bundleno = 417 (0x1a1), region = 56 }
  0x18   : > { %v1438_v0 = vld [vmem:[%s1659_s17 + $0x38] sm:$0xff]  ;;  %v1437_v1 = vld [vmem:[%s1659_s17 + $0x30] sm:$0xff]  ;;  %v1436_v3 = vld [vmem:[%s1659_s17 + $0x28] sm:$0xff]  ;;  %vm638_vm0 = vcmask 1043456   ;;  %vm625_vm1 = vcmask 64512   ;;  %vm720_vm2 = vcmask 60416  }
  0x19   : > { %564 = vmatpush.bf16.msra.mxu0 %v1438_v0  ;;  %v1446_v2 = vld [vmem:[%s1659_s17 + $0x78] sm:$0xff]  ;;  %1466 = vmatpush.bf16.msra.mxu3 %v1438_v0  ;;  %v1445_v4 = vld [vmem:[%s1659_s17 + $0x70] sm:$0xff]  ;;  %v1435_v5 = vld [vmem:[%s1659_s17 + $0x20] sm:$0xff] }
  0x1a   : > { %1474 = vmatpush.bf16.msra.mxu1 %v1446_v2  ;;  %v1444_v6 = vld [vmem:[%s1659_s17 + $0x68] sm:$0xff]  ;;  %v1434_v7 = vld [vmem:[%s1659_s17 + $0x18] sm:$0xff]  ;;  %v1443_v8 = vld [vmem:[%s1659_s17 + $0x60] sm:$0xff] }
  0x1b   : > { %v1433_v9 = vld [vmem:[%s1659_s17 + $0x10] sm:$0xff]  ;;  %v1442_v10 = vld [vmem:[%s1659_s17 + $0x58] sm:$0xff]  ;;  %v1432_v11 = vld [vmem:[%s1659_s17 + $0x8] sm:$0xff] }
  0x1c   : > { %v1441_v12 = vld [vmem:[%s1659_s17 + $0x50] sm:$0xff]  ;;  %v1431_v13 = vld [vmem:[%s1659_s17] sm:$0xff]  ;;  %v1426_v15 = vld [vmem:[%s1862_s2 + $0x4] sm:$0xf0] }
  0x1d   : > { %565 = vmatpush.bf16.msra.mxu0 %v1437_v1  ;;  %1467 = vmatpush.bf16.msra.mxu3 %v1437_v1  ;;  %v1248_v14 = vld [vmem:[%s1862_s2] sm:$0xf]  ;;  %v1440_v16 = vld [vmem:[%s1659_s17 + $0x48] sm:$0xff]  ;;  %v1256_v18 = vld [vmem:[%s1862_s2 + $0x10] sm:$0xf] }
  0x1e   : > { %1475 = vmatpush.bf16.msra.mxu1 %v1445_v4  ;;  %v1249_v17 = vor.u32 %v1426_v15, %v1248_v14  ;;  %v1428_v19 = vld [vmem:[%s1862_s2 + $0x14] sm:$0xf0]  ;;  %v1439_v20 = vld [vmem:[%s1659_s17 + $0x40] sm:$0xff]  ;;  %v1427_v22 = vld [vmem:[%s1862_s2 + $0x14] sm:$0xf] }
  0x1f   : > { %v1257_v21 = vor.u32 %v1428_v19, %v1256_v18  ;;  %v1258_v23 = vld [vmem:[%s1862_s2 + $0x18] sm:$0xf0]  ;;  %v1264_v25 = vld [vmem:[%s1862_s2 + $0x20] sm:$0xf]  ;;  %v1430_v26 = vld [vmem:[%s1862_s2 + $0x24] sm:$0xf0] }
  0x20   : > { %v1261_v24 = vor.u32 %v1427_v22, %v1258_v23  ;;  %v1429_v27 = vld [vmem:[%s1862_s2 + $0x24] sm:$0xf]  ;;  %v1266_v28 = vld [vmem:[%s1862_s2 + $0x28] sm:$0xf0]  ;;  %v1265_v29 = vor.u32 %v1430_v26, %v1264_v25  ;;  %v398_v31 = vld [vmem:[%s1862_s2 + $0x30] sm:$0xff] }
  0x21   : > { %566 = vmatpush.bf16.msra.mxu0 %v1436_v3  ;;  %1468 = vmatpush.bf16.msra.mxu3 %v1436_v3  ;;  %v1269_v30 = vor.u32 %v1429_v27, %v1266_v28  ;;  %v1425_v32 = vld [vmem:[%s1862_s2 + $0x4] sm:$0xf]  ;;  %v1250_v33 = vld [vmem:[%s1862_s2 + $0x8] sm:$0xf0]  ;;  %v450_v34 = vunpack.c.l.b16 %v398_v31  ;;  %v451_v36 = vunpack.c.h.b16 %v398_v31  ;;  %v624_v40 = vld [vmem:[%s1863_s3] sm:$0xf] }
  0x22   : > { %1476 = vmatpush.bf16.msra.mxu1 %v1444_v6  ;;  %v1253_v35 = vor.u32 %v1425_v32, %v1250_v33  ;;  %v640_v42 = vsel %vm638_vm0, %v624_v40, 0  ;;  %v701_v23 = vld [vmem:[%s1866_s6 + $0x10] sm:$0xff] }
  0x23   : > { %v458_v37 = vpack.c.b16 %v450_v34, %v450_v34  ;;  %v459_v38 = vpack.c.b16 %v451_v36, %v451_v36  ;;  %649 = vmatpush.bf16.msra.mxu2 %v640_v42 }
  0x25   : > { %567 = vmatpush.bf16.msra.mxu0 %v1435_v5  ;;  %1469 = vmatpush.bf16.msra.mxu3 %v1435_v5  ;;  %v1536_v5 = vld [vmem:[%s1865_s5] ss:$0 sm:$0xff] }
  0x26   : > { %1477 = vmatpush.bf16.msra.mxu1 %v1443_v8 }
  0x29   : > { %568 = vmatpush.bf16.msra.mxu0 %v1434_v7  ;;  %1470 = vmatpush.bf16.msra.mxu3 %v1434_v7 }
  0x2a   : > { %1478 = vmatpush.bf16.msra.mxu1 %v1442_v10 }
  0x2d   : > { %569 = vmatpush.bf16.msra.mxu0 %v1433_v9  ;;  %1471 = vmatpush.bf16.msra.mxu3 %v1433_v9  ;;  %v699_v9 = vld [vmem:[%s1866_s6] sm:$0xff] }
  0x2e   : > { %1479 = vmatpush.bf16.msra.mxu1 %v1441_v12 }
  0x31   : > { %570 = vmatpush.bf16.msra.mxu0 %v1432_v11  ;;  %1472 = vmatpush.bf16.msra.mxu3 %v1432_v11 }
  0x32   : > { %1480 = vmatpush.bf16.msra.mxu1 %v1440_v16 }
  0x35   : > { %571 = vmatpush.bf16.msra.mxu0 %v1431_v13  ;;  %1473 = vmatpush.bf16.msra.mxu3 %v1431_v13 }
  0x36   : > { %1481 = vmatpush.bf16.msra.mxu1 %v1439_v20 }
  0x38   : > { %572 = vmatmul.bf16.vlgmr.msra.gmra.mxu0 %v1249_v17  ;;  %577 = vmatmul.bf16.vlgmr.msra.gmra.mxu3 %v1257_v21 }
  0x39   : > { %592 = vmatpush.bf16.msrb.mxu0 %v1446_v2  ;;  %605 = vmatmul.bf16.vlgmr.msra.gmra.mxu1 %v1261_v24 }
  0x3d   : > { %593 = vmatpush.bf16.msrb.mxu0 %v1445_v4  ;;  %v1535_v4 = vld [vmem:[%s1864_s4] ss:$0 sm:$0xff] }
  0x41   : > { %594 = vmatpush.bf16.msrb.mxu0 %v1444_v6 }
  0x45   : > { %595 = vmatpush.bf16.msrb.mxu0 %v1443_v8 }
  0x48   : > { %582 = vmatmul.bf16.gmra.mxu3 %v1265_v29 }
  0x49   : > { %596 = vmatpush.bf16.msrb.mxu0 %v1442_v10  ;;  %610 = vmatmul.bf16.gmra.mxu1 %v1269_v30  ;;  %v702_v30 = vld [vmem:[%s1866_s6 + $0x18] sm:$0xff] }
  0x4d   : > { %597 = vmatpush.bf16.msrb.mxu0 %v1441_v12 }
  0x51   : > { %598 = vmatpush.bf16.msrb.mxu0 %v1440_v16  ;;  %v700_v16 = vld [vmem:[%s1866_s6 + $0x8] sm:$0xff] }
  0x55   : > { %599 = vmatpush.bf16.msrb.mxu0 %v1439_v20 }
  0x58   : > { %600 = vmatmul.bf16.vlgmr.msrb.gmra.mxu0 %v1253_v35  ;;  %587 = vmatmul.bf16.gmra.mxu3 %v458_v37  ;;  %v703_v37 = vld [vmem:[%s1866_s6 + $0x20] sm:$0xff] }
  0x59   : > { %615 = vmatmul.bf16.gmra.mxu1 %v459_v38 }
  0xb5   : > { %v573_v43 = vpop.f32.mrf.mxu0 }
  0xb6   : > { %v606_v39 = vpop.f32.mrf.mxu1 }
  0xbb   : > { %v578_v41 = vpop.f32.mrf.mxu3 }
  0xbc   : > { %v607_v60 = vadd.f32 %v606_v39, %v578_v41 }
  0xbd   : > { %v575_v46 = vpop.f32.mrf.mxu0 }
  0xbe   : > { %v608_v45 = vpop.f32.mrf.mxu1 }
  0xc3   : > { %v580_v44 = vpop.f32.mrf.mxu3 }
  0xc4   : > { %v609_v61 = vadd.f32 %v608_v45, %v580_v44  ;;  %v704_v44 = vld [vmem:[%s1866_s6 + $0x28] sm:$0xff] }
  0xc6   : > { %v611_v48 = vpop.f32.mrf.mxu1  ;;  %v621_v62 = vpack.c.bf16 %v609_v61, %v607_v60 }
  0xcb   : > { %v583_v47 = vpop.f32.mrf.mxu3 }
  0xcc   : > { %v612_v63 = vadd.f32 %v611_v48, %v583_v47 }
  0xce   : > { %v613_v51 = vpop.f32.mrf.mxu1 }
  0xd3   : > { %v585_v50 = vpop.f32.mrf.mxu3 }
  0xd4   : > { %v614_v0 = vadd.f32 %v613_v51, %v585_v50  ;;  %v705_v51 = vld [vmem:[%s1866_s6 + $0x30] sm:$0xff] }
  0xd5   : > { %v601_v49 = vpop.f32.mrf.mxu0 }
  0xd6   : > { %v602_v53 = vadd.f32 %v601_v49, %v573_v43  ;;  %v616_v57 = vpop.f32.mrf.mxu1  ;;  %v622_v1 = vpack.c.bf16 %v614_v0, %v612_v63 }
  0xdb   : > { %v588_v56 = vpop.f32.mrf.mxu3 }
  0xdc   : > { %v617_v2 = vadd.f32 %v616_v57, %v588_v56 }
  0xdd   : > { %v603_v52 = vpop.f32.mrf.mxu0 }
  0xde   : > { %v604_v54 = vadd.f32 %v603_v52, %v575_v46  ;;  %v618_v59 = vpop.f32.mrf.mxu1  ;;  %v623_v3 = vpack.c.bf16 %v617_v2, %v617_v2 }
  0xe0   : > { %v620_v55 = vpack.c.bf16 %v604_v54, %v602_v53 }
  0xe2   : > { %1334 = vmatmul.msk.bf16.vlgmr.msra.gmra.mxu2 %vm625_vm1, %v620_v55 }
  0xe3   : > { %v590_v58 = vpop.f32.mrf.mxu3 }
  0xf2   : > { %1335 = vmatmul.msk.bf16.gmra.mxu2 %vm625_vm1, %v621_v62 }
 0x102   : > { %1336 = vmatmul.msk.bf16.gmra.mxu2 %vm625_vm1, %v622_v1 }
 0x112   : > { %1337 = vmatmul.msk.bf16.gmra.mxu2 %vm625_vm1, %v623_v3 }
 0x165   : > { %v651_v6 = vpop.f32.mrf.mxu2 }
 0x166   : > { %v674_v7 = vmul.f32 %v1535_v4, %v651_v6 }
 0x168   : > { %v685_v8 = vadd.f32 %v1536_v5, %v674_v7 }
 0x16a   : > { %v692_v10 = vmax.f32 %v685_v8, 0.0 }
 0x16c   : > { %v706_v11 = vmul.f32 %v699_v9, %v692_v10 }
 0x16d   : > { %v653_v12 = vpop.f32.mrf.mxu2 }
 0x16e   : > { %v713_v13 = vpack.c.bf16 %v706_v11, %v706_v11  ;;  %v675_v14 = vmul.f32 %v1535_v4, %v653_v12 }
 0x170   : > { %721 = vst.msk [vmem:[#allocation2] sm:$0xf] %vm720_vm2, %v713_v13  ;;  %v686_v15 = vadd.f32 %v1536_v5, %v675_v14 }
 0x172   : > { %v693_v17 = vmax.f32 %v686_v15, 0.0 }
 0x174   : > { %v707_v18 = vmul.f32 %v700_v16, %v693_v17 }
 0x175   : > { %v656_v19 = vpop.f32.mrf.mxu2 }
 0x176   : > { %v714_v20 = vpack.c.bf16 %v707_v18, %v707_v18  ;;  %v676_v21 = vmul.f32 %v1535_v4, %v656_v19 }
 0x178   : > { %722 = vst.msk [vmem:[#allocation2 + $0x4] sm:$0xf] %vm720_vm2, %v714_v20  ;;  %v687_v22 = vadd.f32 %v1536_v5, %v676_v21 }
 0x17a   : > { %v694_v24 = vmax.f32 %v687_v22, 0.0 }
 0x17c   : > { %v708_v25 = vmul.f32 %v701_v23, %v694_v24 }
 0x17d   : > { %v658_v26 = vpop.f32.mrf.mxu2 }
 0x17e   : > { %v715_v27 = vpack.c.bf16 %v708_v25, %v708_v25  ;;  %v677_v28 = vmul.f32 %v1535_v4, %v658_v26 }
 0x180   : > { %723 = vst.msk [vmem:[#allocation2 + $0x8] sm:$0xf] %vm720_vm2, %v715_v27  ;;  %v688_v29 = vadd.f32 %v1536_v5, %v677_v28 }
 0x182   : > { %v695_v31 = vmax.f32 %v688_v29, 0.0 }
 0x184   : > { %v709_v32 = vmul.f32 %v702_v30, %v695_v31 }
 0x185   : > { %v661_v33 = vpop.f32.mrf.mxu2 }
 0x186   : > { %v716_v34 = vpack.c.bf16 %v709_v32, %v709_v32  ;;  %v678_v35 = vmul.f32 %v1535_v4, %v661_v33 }
 0x188   : > { %724 = vst.msk [vmem:[#allocation2 + $0xc] sm:$0xf] %vm720_vm2, %v716_v34  ;;  %v689_v36 = vadd.f32 %v1536_v5, %v678_v35 }
 0x18a   : > { %v696_v38 = vmax.f32 %v689_v36, 0.0 }
 0x18c   : > { %v710_v39 = vmul.f32 %v703_v37, %v696_v38 }
 0x18d   : > { %v663_v40 = vpop.f32.mrf.mxu2 }
 0x18e   : > { %v717_v41 = vpack.c.bf16 %v710_v39, %v710_v39  ;;  %v679_v42 = vmul.f32 %v1535_v4, %v663_v40 }
 0x190   : > { %725 = vst.msk [vmem:[#allocation2 + $0x10] sm:$0xf] %vm720_vm2, %v717_v41  ;;  %v690_v43 = vadd.f32 %v1536_v5, %v679_v42 }
 0x192   : > { %v697_v45 = vmax.f32 %v690_v43, 0.0 }
 0x194   : > { %v711_v46 = vmul.f32 %v704_v44, %v697_v45 }
 0x195   : > { %v666_v47 = vpop.f32.mrf.mxu2 }
 0x196   : > { %v718_v48 = vpack.c.bf16 %v711_v46, %v711_v46  ;;  %v680_v49 = vmul.f32 %v1535_v4, %v666_v47 }
 0x198   : > { %726 = vst.msk [vmem:[#allocation2 + $0x14] sm:$0xf] %vm720_vm2, %v718_v48  ;;  %v691_v50 = vadd.f32 %v1536_v5, %v680_v49 }
 0x19a   : > { %v698_v52 = vmax.f32 %v691_v50, 0.0 }
 0x19c   : > { %v712_v53 = vmul.f32 %v705_v51, %v698_v52 }
 0x19d   : > { %v668_v54 = vpop.f32.mrf.mxu2 }
 0x19e   : > { %v719_v55 = vpack.c.bf16 %v712_v53, %v712_v53 }
 0x1a0   : > { %727 = vst.msk [vmem:[#allocation2 + $0x18] sm:$0xf] %vm720_vm2, %v719_v55 }
 0x1a1 PF: > { %vm837_vm3 = vcmask 1043456   ;;  %v1457_v60 = vld [vmem:[#allocation2 + $0x10] sm:$0xff]  ;;  %v1456_v61 = vld [vmem:[#allocation2 + $0x8] sm:$0xff]  ;;  %v1455_v62 = vld [vmem:[#allocation2] sm:$0xff]  ;;  %vm812_vm4 = vcmask 457728   ;;  %vm1018_vm5 = vcmask 64512  }
 0x1a2   : > { %v1447_v63 = vld [vmem:[%s1669_s26] sm:$0xff]  ;;  %v1449_v0 = vld [vmem:[%s1669_s26 + $0x10] sm:$0xff]  ;;  %v1448_v3 = vld [vmem:[%s1669_s26 + $0x8] sm:$0xff]  ;;  %vm1099_vm6 = vcmask 125952  }
 0x1a3   : > { %v1453_v1 = vld [vmem:[%s1669_s26 + $0x30] sm:$0xff]  ;;  %v1451_v2 = vld [vmem:[%s1669_s26 + $0x20] sm:$0xff]  ;;  %v1450_v4 = vld [vmem:[%s1669_s26 + $0x18] sm:$0xff] }
 0x1a4   : > { %v1454_v5 = vld [vmem:[%s1669_s26 + $0x38] sm:$0xff]  ;;  %v1452_v6 = vld [vmem:[%s1669_s26 + $0x28] sm:$0xff]  ;;  %s1577_s26 = smov 8  }
 0x1a7   : > { %v750_v56 = vld [vmem:[#allocation2 + $0x18] sm:$0xf] }
 0x1a8   : > { %v804_v57 = vunpack.c.l.b16 %v750_v56 }
 0x1aa   : > { %v808_v58 = vpack.c.b16 %v804_v57, %v804_v57 }
 0x1ac   : > { %v839_v59 = vsel %vm837_vm3, %v808_v58, 0 }
 0x1ad   : > { %845 = vmatpush.bf16.msra.mxu0 %v839_v59  ;;  %1482 = vmatpush.bf16.msra.mxu1 %v839_v59 }
 0x1ae   : > { %1484 = vmatpush.bf16.msra.mxu3 %v839_v59  ;;  %1483 = vmatpush.bf16.msra.mxu2 %v839_v59 }
 0x1b1   : > { %846 = vmatpush.bf16.msra.mxu0 %v1457_v60  ;;  %1485 = vmatpush.bf16.msra.mxu1 %v1457_v60 }
 0x1b2   : > { %1487 = vmatpush.bf16.msra.mxu3 %v1457_v60  ;;  %1486 = vmatpush.bf16.msra.mxu2 %v1457_v60 }
 0x1b5   : > { %847 = vmatpush.bf16.msra.mxu0 %v1456_v61  ;;  %1488 = vmatpush.bf16.msra.mxu1 %v1456_v61 }
 0x1b6   : > { %1490 = vmatpush.bf16.msra.mxu3 %v1456_v61  ;;  %1489 = vmatpush.bf16.msra.mxu2 %v1456_v61 }
 0x1b9   : > { %848 = vmatpush.bf16.msra.mxu0 %v1455_v62  ;;  %1491 = vmatpush.bf16.msra.mxu1 %v1455_v62 }
 0x1ba   : > { %1493 = vmatpush.bf16.msra.mxu3 %v1455_v62  ;;  %1492 = vmatpush.bf16.msra.mxu2 %v1455_v62 }
 0x1bc   : > { %1382 = vmatmul.msk.bf16.vlgmr.msra.gmra.mxu0 %vm812_vm4, %v1447_v63  ;;  %1384 = vmatmul.msk.bf16.vlgmr.msra.gmra.mxu1 %vm812_vm4, %v1449_v0  ;;  %v1462_v63 = vld [vmem:[%s1664_s23 + $0x20] sm:$0xff] }
 0x1bd   : > { %1388 = vmatmul.msk.bf16.vlgmr.msra.gmra.mxu3 %vm812_vm4, %v1453_v1  ;;  %1386 = vmatmul.msk.bf16.vlgmr.msra.gmra.mxu2 %vm812_vm4, %v1451_v2 }
 0x1cc   : > { %1383 = vmatmul.msk.bf16.gmra.mxu0 %vm812_vm4, %v1448_v3  ;;  %1385 = vmatmul.msk.bf16.gmra.mxu1 %vm812_vm4, %v1450_v4 }
 0x1cd   : > { %1389 = vmatmul.msk.bf16.gmra.mxu3 %vm812_vm4, %v1454_v5  ;;  %1387 = vmatmul.msk.bf16.gmra.mxu2 %vm812_vm4, %v1452_v6  ;;  %v1463_v6 = vld [vmem:[%s1664_s23 + $0x28] sm:$0xff] }
 0x239   : > { %v850_v7 = vpop.f32.mrf.mxu0  ;;  %v860_v8 = vpop.f32.mrf.mxu1 }
 0x23a   : > { %v906_v9 = vpack.c.bf16 %v850_v7, %v850_v7  ;;  %v910_v10 = vpack.c.bf16 %v860_v8, %v860_v8  ;;  %v1460_v7 = vld [vmem:[%s1664_s23 + $0x10] sm:$0xff]  ;;  %v1458_v8 = vld [vmem:[%s1664_s23] sm:$0xff] }
 0x23c   : > { %v978_v17 = vunpack.c.l.b16 %v906_v9  ;;  %v982_v18 = vunpack.c.l.b16 %v910_v10 }
 0x240   : > { %v880_v11 = vpop.f32.mrf.mxu3  ;;  %v870_v12 = vpop.f32.mrf.mxu2 }
 0x241   : > { %v852_v13 = vpop.f32.mrf.mxu0  ;;  %v862_v14 = vpop.f32.mrf.mxu1  ;;  %v914_v21 = vpack.c.bf16 %v870_v12, %v870_v12  ;;  %v918_v48 = vpack.c.bf16 %v880_v11, %v880_v11 }
 0x242   : > { %v907_v15 = vpack.c.bf16 %v852_v13, %v852_v13  ;;  %v911_v16 = vpack.c.bf16 %v862_v14, %v862_v14 }
 0x243   : > { %v986_v28 = vunpack.c.l.b16 %v914_v21  ;;  %v990_v58 = vunpack.c.l.b16 %v918_v48 }
 0x244   : > { %v979_v19 = vunpack.c.l.b16 %v907_v15  ;;  %v983_v20 = vunpack.c.l.b16 %v911_v16 }
 0x246   : > { %v996_v22 = vpack.c.b16 %v983_v20, %v982_v18  ;;  %v994_v23 = vpack.c.b16 %v979_v19, %v978_v17 }
 0x248   : > { %v882_v24 = vpop.f32.mrf.mxu3  ;;  %1006 = vrot.lane.b32.xlu1 %v996_v22, %s1577_s26  ;;  %1002 = vrot.lane.b32.xlu0 %v994_v23, %s1577_s26  ;;  %v872_v25 = vpop.f32.mrf.mxu2 }
 0x249   : > { %v855_v26 = vpop.f32.mrf.mxu0  ;;  %v865_v27 = vpop.f32.mrf.mxu1  ;;  %v915_v29 = vpack.c.bf16 %v872_v25, %v872_v25  ;;  %v919_v45 = vpack.c.bf16 %v882_v24, %v882_v24 }
 0x24a   : > { %v908_v32 = vpack.c.bf16 %v855_v26, %v855_v26  ;;  %v912_v33 = vpack.c.bf16 %v865_v27, %v865_v27  ;;  %v1461_v27 = vld [vmem:[%s1664_s23 + $0x18] sm:$0xff] }
 0x24b   : > { %v987_v30 = vunpack.c.l.b16 %v915_v29  ;;  %v991_v55 = vunpack.c.l.b16 %v919_v45 }
 0x24c   : > { %v980_v40 = vunpack.c.l.b16 %v908_v32  ;;  %v984_v41 = vunpack.c.l.b16 %v912_v33 }
 0x24d   : > { %v998_v31 = vpack.c.b16 %v987_v30, %v986_v28  ;;  %v1000_v61 = vpack.c.b16 %v991_v55, %v990_v58  ;;  %v1459_v28 = vld [vmem:[%s1664_s23 + $0x8] sm:$0xff] }
 0x24f   : > { %1010 = vrot.lane.b32.xlu2 %v998_v31, %s1577_s26 }
 0x250   : > { %v885_v34 = vpop.f32.mrf.mxu3  ;;  %v875_v35 = vpop.f32.mrf.mxu2 }
 0x251   : > { %v857_v36 = vpop.f32.mrf.mxu0  ;;  %v867_v37 = vpop.f32.mrf.mxu1  ;;  %v916_v44 = vpack.c.bf16 %v875_v35, %v875_v35  ;;  %v920_v49 = vpack.c.bf16 %v885_v34, %v885_v34 }
 0x252   : > { %v909_v38 = vpack.c.bf16 %v857_v36, %v857_v36  ;;  %v913_v39 = vpack.c.bf16 %v867_v37, %v867_v37 }
 0x253   : > { %v988_v53 = vunpack.c.l.b16 %v916_v44  ;;  %v992_v59 = vunpack.c.l.b16 %v920_v49 }
 0x254   : > { %v981_v42 = vunpack.c.l.b16 %v909_v38  ;;  %v985_v43 = vunpack.c.l.b16 %v913_v39 }
 0x256   : > { %v995_v46 = vpack.c.b16 %v981_v42, %v980_v40  ;;  %v997_v47 = vpack.c.b16 %v985_v43, %v984_v41  ;;  %v1465_v41 = vld [vmem:[%s1664_s23 + $0x38] sm:$0xff]  ;;  %v1464_v42 = vld [vmem:[%s1664_s23 + $0x30] sm:$0xff] }
 0x258   : > { %v887_v50 = vpop.f32.mrf.mxu3  ;;  %1008 = vrot.lane.b32.xlu1 %v997_v47, %s1577_s26  ;;  %1004 = vrot.lane.b32.xlu0 %v995_v46, %s1577_s26  ;;  %v877_v51 = vpop.f32.mrf.mxu2 }
 0x259   : > { %v921_v52 = vpack.c.bf16 %v887_v50, %v887_v50  ;;  %v917_v54 = vpack.c.bf16 %v877_v51, %v877_v51 }
 0x25b   : > { %v993_v56 = vunpack.c.l.b16 %v921_v52  ;;  %v989_v57 = vunpack.c.l.b16 %v917_v54 }
 0x25d   : > { %v999_v60 = vpack.c.b16 %v989_v57, %v988_v53  ;;  %v1001_v62 = vpack.c.b16 %v993_v56, %v992_v59 }
 0x25f   : > { %1012 = vrot.lane.b32.xlu2 %v999_v60, %s1577_s26 }
 0x260   : > { %1016 = vrot.lane.b32.xlu1 %v1001_v62, %s1577_s26  ;;  %1014 = vrot.lane.b32.xlu0 %v1000_v61, %s1577_s26 }
 0x2a9   : > { %v1011_v0 = vpop.permute.xlu2 %1010 }
 0x2aa   : > { %v1033_v1 = vsel %vm1018_vm5, %v1462_v63, %v1011_v0 }
 0x2ab   : > { %v1059_v2 = vunpack.c.l.b16 %v1033_v1  ;;  %v1060_v3 = vunpack.c.h.b16 %v1033_v1 }
 0x2ad   : > { %v1075_v4 = vpack.c.b16 %v1059_v2, %v1059_v2  ;;  %v1076_v5 = vpack.c.b16 %v1060_v3, %v1060_v3 }
 0x2af   : > { %1108 = vst.msk [vmem:[%s1674_s10 + $0x20] sm:$0xf] %vm1099_vm6, %v1075_v4 }
 0x2b0   : > { %1109 = vst.msk [vmem:[%s1674_s10 + $0x24] sm:$0xf] %vm1099_vm6, %v1076_v5 }
 0x2b9   : > { %v1013_v9 = vpop.permute.xlu2 %1012 }
 0x2ba   : > { %v1007_v10 = vpop.permute.xlu1 %1006  ;;  %v1003_v11 = vpop.permute.xlu0 %1002  ;;  %v1036_v12 = vsel %vm1018_vm5, %v1463_v6, %v1013_v9 }
 0x2bb   : > { %v1027_v13 = vsel %vm1018_vm5, %v1460_v7, %v1007_v10  ;;  %v1021_v14 = vsel %vm1018_vm5, %v1458_v8, %v1003_v11  ;;  %v1061_v15 = vunpack.c.l.b16 %v1036_v12  ;;  %v1062_v16 = vunpack.c.h.b16 %v1036_v12 }
 0x2bc   : > { %v1055_v17 = vunpack.c.l.b16 %v1027_v13  ;;  %v1056_v18 = vunpack.c.h.b16 %v1027_v13  ;;  %v1051_v19 = vunpack.c.l.b16 %v1021_v14  ;;  %v1052_v20 = vunpack.c.h.b16 %v1021_v14 }
 0x2bd   : > { %v1077_v21 = vpack.c.b16 %v1061_v15, %v1061_v15  ;;  %v1078_v26 = vpack.c.b16 %v1062_v16, %v1062_v16 }
 0x2be   : > { %v1071_v22 = vpack.c.b16 %v1055_v17, %v1055_v17  ;;  %v1072_v23 = vpack.c.b16 %v1056_v18, %v1056_v18  ;;  %v1067_v24 = vpack.c.b16 %v1051_v19, %v1051_v19  ;;  %v1068_v25 = vpack.c.b16 %v1052_v20, %v1052_v20 }
 0x2bf   : > { %1110 = vst.msk [vmem:[%s1674_s10 + $0x28] sm:$0xf] %vm1099_vm6, %v1077_v21 }
 0x2c0   : > { %1104 = vst.msk [vmem:[%s1674_s10 + $0x10] sm:$0xf] %vm1099_vm6, %v1071_v22 }
 0x2c1   : > { %1105 = vst.msk [vmem:[%s1674_s10 + $0x14] sm:$0xf] %vm1099_vm6, %v1072_v23 }
 0x2c2   : > { %1100 = vst.msk [vmem:[%s1674_s10] sm:$0xf] %vm1099_vm6, %v1067_v24 }
 0x2c3   : > { %1101 = vst.msk [vmem:[%s1674_s10 + $0x4] sm:$0xf] %vm1099_vm6, %v1068_v25 }
 0x2c4   : > { %1111 = vst.msk [vmem:[%s1674_s10 + $0x2c] sm:$0xf] %vm1099_vm6, %v1078_v26 }
 0x2ca   : > { %v1009_v29 = vpop.permute.xlu1 %1008  ;;  %v1005_v30 = vpop.permute.xlu0 %1004 }
 0x2cb   : > { %v1030_v31 = vsel %vm1018_vm5, %v1461_v27, %v1009_v29  ;;  %v1024_v32 = vsel %vm1018_vm5, %v1459_v28, %v1005_v30 }
 0x2cc   : > { %v1057_v33 = vunpack.c.l.b16 %v1030_v31  ;;  %v1058_v34 = vunpack.c.h.b16 %v1030_v31  ;;  %v1053_v35 = vunpack.c.l.b16 %v1024_v32  ;;  %v1054_v36 = vunpack.c.h.b16 %v1024_v32 }
 0x2ce   : > { %v1073_v37 = vpack.c.b16 %v1057_v33, %v1057_v33  ;;  %v1074_v38 = vpack.c.b16 %v1058_v34, %v1058_v34  ;;  %v1069_v39 = vpack.c.b16 %v1053_v35, %v1053_v35  ;;  %v1070_v40 = vpack.c.b16 %v1054_v36, %v1054_v36 }
 0x2d0   : > { %1106 = vst.msk [vmem:[%s1674_s10 + $0x18] sm:$0xf] %vm1099_vm6, %v1073_v37 }
 0x2d1   : > { %1107 = vst.msk [vmem:[%s1674_s10 + $0x1c] sm:$0xf] %vm1099_vm6, %v1074_v38 }
 0x2d2   : > { %1102 = vst.msk [vmem:[%s1674_s10 + $0x8] sm:$0xf] %vm1099_vm6, %v1069_v39  ;;  %v1017_v43 = vpop.permute.xlu1 %1016  ;;  %v1015_v44 = vpop.permute.xlu0 %1014 }
 0x2d3   : > { %1103 = vst.msk [vmem:[%s1674_s10 + $0xc] sm:$0xf] %vm1099_vm6, %v1070_v40  ;;  %v1042_v45 = vsel %vm1018_vm5, %v1465_v41, %v1017_v43  ;;  %v1039_v46 = vsel %vm1018_vm5, %v1464_v42, %v1015_v44 }
 0x2d4   : > { %v1065_v47 = vunpack.c.l.b16 %v1042_v45  ;;  %v1066_v48 = vunpack.c.h.b16 %v1042_v45  ;;  %v1063_v49 = vunpack.c.l.b16 %v1039_v46  ;;  %v1064_v50 = vunpack.c.h.b16 %v1039_v46 }
 0x2d6   : > { %v1081_v51 = vpack.c.b16 %v1065_v47, %v1065_v47  ;;  %v1082_v52 = vpack.c.b16 %v1066_v48, %v1066_v48  ;;  %v1079_v53 = vpack.c.b16 %v1063_v49, %v1063_v49  ;;  %v1080_v54 = vpack.c.b16 %v1064_v50, %v1064_v50 }
 0x2d8   : > { %1114 = vst.msk [vmem:[%s1674_s10 + $0x38] sm:$0xf] %vm1099_vm6, %v1081_v51 }
 0x2d9   : > { %1115 = vst.msk [vmem:[%s1674_s10 + $0x3c] sm:$0xf] %vm1099_vm6, %v1082_v52 }
 0x2da   : > { %1112 = vst.msk [vmem:[%s1674_s10 + $0x30] sm:$0xf] %vm1099_vm6, %v1079_v53 }
 0x2db   : > { %1113 = vst.msk [vmem:[%s1674_s10 + $0x34] sm:$0xf] %vm1099_vm6, %v1080_v54 }
 0x2dc PF: > { %s18_s9 = sadd.s32 1, %s1575_s9   ;;  %s1871_s23 = sld [smem:[#allocation3_spill]] }
 0x2dd   : > { %p15_p8 = scmp.ge.s32.totalorder %s18_s9, 6   ;;  %s1872_s25 = sld [smem:[#allocation4_spill]] }
 0x2de   : > { %s1873_s27 = smov %s1567_s29  ;;  %s1874_s28 = smov %s1571_s30 }
 0x2df   :  { %17 = sbr.rel (!%p15_p8) target bundleno = 3 (0x3), region = 92 }
 0x2e2   : > { %s1875_s29 = smov %s1871_s23 }
 0x2e3   : > { %s1876_s30 = smov %s1872_s25 }

</bundles_post_ra>
